<compile_context>
chip_gen: v7x
topology: tpu7x:2x2x1
jax: 0.10.0
libtpu: 0.0.40
codegen_flags: <defaults>
</compile_context>

<pallas_src>
import functools
import math

import jax
import jax.numpy as jnp
from jax.experimental import pallas as pl
from jax.experimental.pallas import tpu as pltpu


# ---------------------------------------------------------------------------
# Chip-aware sizing helpers
# ---------------------------------------------------------------------------

@functools.lru_cache(maxsize=None)
def _chip_info():
    """(vmem_capacity_bytes, tensorcores_sharing_the_grid)."""
    vmem = 64 * 1024 * 1024                       # conservative (v7x per-core)
    try:
        vmem = int(pltpu.get_tpu_info().vmem_capacity_bytes)
    except Exception:
        pass
    cores = 1
    try:
        kind = jax.devices()[0].device_kind.lower()
        # 2 TensorCores share a `parallel` grid axis on v7x and megacore chips.
        if "v7" in kind or "v4" in kind or "v5p" in kind or "v5 p" in kind:
            cores = 2
    except Exception:
        pass
    return vmem, cores


def _vmem_limit_bytes() -> int:
    vmem, _ = _chip_info()
    return int(min(vmem * 3 // 4, 100 * 1024 * 1024))


def _block_target_bytes(itemsize: int) -> int:
    """Target size (bytes) of one input block, capped by what fits in VMEM."""
    vmem, _ = _chip_info()
    # v7x (64 MiB VMEM, 3.2 TB/s HBM) drains blocks ~2.3x faster, so the fixed
    # ~0.35 us per grid step hurts more -> aim bigger there.
    target = 4 * 1024 * 1024 if vmem <= 64 * 1024 * 1024 else 2 * 1024 * 1024
    # Per-block footprint ~= 2x in + 2x out (input dtype) + ~3 f32 temporaries.
    mult = 4 * itemsize + 3 * 4
    max_block = (_vmem_limit_bytes() * itemsize) // mult
    return max(min(target, max_block), 8 * 128 * itemsize)


def _compiler_params(dims):
    return pltpu.CompilerParams(
        dimension_semantics=dims,
        vmem_limit_bytes=_vmem_limit_bytes(),
    )


def _ceil_to(x: int, m: int) -> int:
    return -(-x // m) * m


def _pick_row_tile(rows: int, width: int, itemsize: int) -> int:
    """Row tile for a (rows, width) slab: bytes-based target, sublane aligned,
    split only when >=2 TensorCores can actually share the grid."""
    _, cores = _chip_info()
    sub = max(8, 32 // max(itemsize, 1))                  # 8 (f32) / 16 (bf16)
    row_bytes = max(width * itemsize, 1)
    tm = max(_block_target_bytes(itemsize) // row_bytes, sub)
    if tm >= rows:
        if cores >= 2 and rows >= 2 * sub:
            # Balanced `cores`-way split, rounding UP to the sublane multiple
            # so cdiv(rows, tm) == cores (no lopsided third block).
            tm = _ceil_to(-(-rows // cores), sub)
            return min(tm, rows)
        return rows                                        # full extent: legal
    tm = max((tm // sub) * sub, sub)
    return min(tm, rows)


def _pick_cfirst_tiles(n: int, c: int, hw: int, itemsize: int):
    """(bn, t_hw) for the channels_first kernel: pack N images per block until
    the block hits the bytes target; split HW only for large images."""
    _, cores = _chip_info()
    target = _block_target_bytes(itemsize)
    img_bytes = c * hw * itemsize
    if img_bytes >= target:
        bn = 1
        t_hw = max(target // max(c * itemsize, 1), 128)
        if t_hw >= hw:
            t_hw = hw
        else:
            t_hw = max((t_hw // 128) * 128, 128)
    else:
        t_hw = hw
        bn = min(max(target // max(img_bytes, 1), 1), n)
        if cores >= 2 and bn >= n and n >= 2:
            bn = -(-n // cores)            # balanced split along N for 2 TCs
    if cores >= 2 and bn >= n and t_hw >= hw and n == 1 and hw >= 256:
        t_hw = min(max(_ceil_to(-(-hw // cores), 128), 128), hw)
    return bn, t_hw


def _pick_pack_factor(rows: int, c: int):
    """Rows packed per lane-dense row for small/awkward C (None = no packing)."""
    base = 128 // math.gcd(c, 128)
    if base == 1:
        return 1                                           # already lane-aligned
    cands = []
    m = 1
    while True:
        k = base * m
        if k > 128 or k * c > 1024 or k > rows:
            break
        cands.append(k)
        m += 1
    if not cands:
        return None
    divisors = [k for k in cands if rows % k == 0]
    big_div = [k for k in divisors if k * c >= 512]
    if big_div:
        return big_div[0]
    if divisors:
        return divisors[-1]
    big = [k for k in cands if k * c >= 512]
    if big:
        return big[0]
    return cands[-1]


# ---------------------------------------------------------------------------
# channels_last, C % 128 == 0 (or tiny remainder): plain row-tiled kernel
# ---------------------------------------------------------------------------

def _ln_rows_kernel(x_ref, w_ref, b_ref, o_ref, *, eps, inv_c):
    x = x_ref[...].astype(jnp.float32)                      # (tm, C)
    mean = jnp.sum(x, axis=-1, keepdims=True) * inv_c
    d = x - mean
    var = jnp.sum(d * d, axis=-1, keepdims=True) * inv_c    # two-pass variance
    inv = jax.lax.rsqrt(var + eps)
    w = w_ref[...].astype(jnp.float32)
    b = b_ref[...].astype(jnp.float32)
    o_ref[...] = (d * inv * w + b).astype(o_ref.dtype)


def _ln_rows_call(x2d, w2d, b2d, eps):
    rows, c = x2d.shape
    tm = _pick_row_tile(rows, c, x2d.dtype.itemsize)
    kernel = functools.partial(_ln_rows_kernel, eps=float(eps), inv_c=1.0 / c)
    return pl.pallas_call(
        kernel,
        out_shape=jax.ShapeDtypeStruct((rows, c), x2d.dtype),
        grid_spec=pl.GridSpec(
            grid=(pl.cdiv(rows, tm),),
            in_specs=[
                pl.BlockSpec((tm, c), lambda i: (i, 0)),
                pl.BlockSpec((1, c), lambda i: (0, 0)),
                pl.BlockSpec((1, c), lambda i: (0, 0)),
            ],
            out_specs=pl.BlockSpec((tm, c), lambda i: (i, 0)),
        ),
        compiler_params=_compiler_params(("parallel",)),
    )(x2d, w2d, b2d)


# ---------------------------------------------------------------------------
# channels_last, small/awkward C: lane-packed kernel (segment matmuls on MXU)
# ---------------------------------------------------------------------------

def _ln_packed_kernel(x_ref, w_ref, b_ref, fwd_ref, bwd_ref, o_ref, *, eps, inv_c):
    x = x_ref[...].astype(jnp.float32)                      # (tm, k*C)
    fwd = fwd_ref[...]                                      # (k*C, k), resident
    bwd = bwd_ref[...]                                      # (k, k*C), resident
    s1 = jnp.dot(x, fwd, preferred_element_type=jnp.float32)      # (tm, k)
    mean = s1 * inv_c
    mean_b = jnp.dot(mean, bwd, preferred_element_type=jnp.float32)
    d = x - mean_b
    s2 = jnp.dot(d * d, fwd, preferred_element_type=jnp.float32)  # two-pass var
    inv = jax.lax.rsqrt(s2 * inv_c + eps)
    inv_b = jnp.dot(inv, bwd, preferred_element_type=jnp.float32)
    w = w_ref[...].astype(jnp.float32)
    b = b_ref[...].astype(jnp.float32)
    o_ref[...] = (d * inv_b * w + b).astype(o_ref.dtype)


def _ln_packed_call(x_p, w_p, b_p, fwd, bwd, eps, c):
    rp, ck = x_p.shape
    tm = _pick_row_tile(rp, ck, x_p.dtype.itemsize)
    kernel = functools.partial(_ln_packed_kernel, eps=float(eps), inv_c=1.0 / c)
    return pl.pallas_call(
        kernel,
        out_shape=jax.ShapeDtypeStruct((rp, ck), x_p.dtype),
        grid_spec=pl.GridSpec(
            grid=(pl.cdiv(rp, tm),),
            in_specs=[
                pl.BlockSpec((tm, ck), lambda i: (i, 0)),
                pl.BlockSpec((1, ck), lambda i: (0, 0)),
                pl.BlockSpec((1, ck), lambda i: (0, 0)),
                pl.BlockSpec(fwd.shape, lambda i: (0, 0)),   # constant block ->
                pl.BlockSpec(bwd.shape, lambda i: (0, 0)),   # fetched once
            ],
            out_specs=pl.BlockSpec((tm, ck), lambda i: (i, 0)),
        ),
        compiler_params=_compiler_params(("parallel",)),
    )(x_p, w_p, b_p, fwd, bwd)


def _segment_matrices(c, k):
    """Host-built segment masks: group g owns lanes [g*C, (g+1)*C)."""
    group_of_lane = jnp.arange(k * c, dtype=jnp.int32) // c          # (k*C,)
    groups = jnp.arange(k, dtype=jnp.int32)
    fwd = (group_of_lane[:, None] == groups[None, :]).astype(jnp.float32)
    return fwd, fwd.T                                                # (ck,k),(k,ck)


# ---------------------------------------------------------------------------
# channels_first: fused NCHW kernel (reduce over the sublane C axis),
# batching several N images per grid step.
# ---------------------------------------------------------------------------

def _ln_cfirst_kernel(x_ref, w_ref, b_ref, o_ref, *, eps, inv_c):
    x = x_ref[...].astype(jnp.float32)                      # (bn, C, T_HW)
    mean = jnp.sum(x, axis=1, keepdims=True) * inv_c        # (bn, 1, T_HW)
    d = x - mean
    var = jnp.sum(d * d, axis=1, keepdims=True) * inv_c     # two-pass variance
    inv = jax.lax.rsqrt(var + eps)
    w = w_ref[...].astype(jnp.float32)                      # (1, C, 1)
    b = b_ref[...].astype(jnp.float32)
    o_ref[...] = (d * inv * w + b).astype(o_ref.dtype)


def _ln_cfirst_call(x3d, w3d, b3d, eps):
    n, c, hw = x3d.shape
    bn, t_hw = _pick_cfirst_tiles(n, c, hw, x3d.dtype.itemsize)
    kernel = functools.partial(_ln_cfirst_kernel, eps=float(eps), inv_c=1.0 / c)
    return pl.pallas_call(
        kernel,
        out_shape=jax.ShapeDtypeStruct((n, c, hw), x3d.dtype),
        grid_spec=pl.GridSpec(
            grid=(pl.cdiv(n, bn), pl.cdiv(hw, t_hw)),
            in_specs=[
                pl.BlockSpec((bn, c, t_hw), lambda i, j: (i, 0, j)),
                pl.BlockSpec((1, c, 1), lambda i, j: (0, 0, 0)),
                pl.BlockSpec((1, c, 1), lambda i, j: (0, 0, 0)),
            ],
            out_specs=pl.BlockSpec((bn, c, t_hw), lambda i, j: (i, 0, j)),
        ),
        compiler_params=_compiler_params(("parallel", "parallel")),
    )(x3d, w3d, b3d)


# ---------------------------------------------------------------------------
# Top-level dispatch (jitted so all reshapes fuse away)
# ---------------------------------------------------------------------------

@functools.partial(jax.jit, static_argnames=("eps",))
def _layernorm_channels_last(x, weight, bias, *, eps):
    c = x.shape[-1]
    rows = x.size // c
    x2d = x.reshape(rows, c)
    k = 1 if c % 128 == 0 else _pick_pack_factor(rows, c)
    if k is not None and k > 1:
        main = (rows // k) * k
        fwd, bwd = _segment_matrices(c, k)
        w_p = jnp.tile(weight, k).reshape(1, k * c).astype(jnp.float32)
        b_p = jnp.tile(bias, k).reshape(1, k * c).astype(jnp.float32)
        x_p = x2d[:main].reshape(main // k, k * c)       # free contiguous view
        y_main = _ln_packed_call(x_p, w_p, b_p, fwd, bwd, eps, c).reshape(main, c)
        if main < rows:
            # <k-row remainder: one tiny lane-sparse call; bulk stays lane-dense.
            y_rem = _ln_rows_call(x2d[main:], weight.reshape(1, c),
                                  bias.reshape(1, c), eps)
            y2d = jnp.concatenate([y_main, y_rem], axis=0)
        else:
            y2d = y_main
    else:
        y2d = _ln_rows_call(x2d, weight.reshape(1, c), bias.reshape(1, c), eps)
    return y2d.reshape(x.shape)


@functools.partial(jax.jit, static_argnames=("eps",))
def _layernorm_channels_first(x, weight, bias, *, eps):
    n, c, h, w = x.shape
    x3d = x.reshape(n, c, h * w)                  # free view -- no HBM transpose
    y3d = _ln_cfirst_call(x3d, weight.reshape(1, c, 1), bias.reshape(1, c, 1), eps)
    return y3d.reshape(n, c, h, w)


class LayerNormPallas:
    """JAX/Pallas port of the ConvNeXt LayerNorm module (forward pass)."""

    def __init__(self, normalized_shape, eps=1e-6, data_format="channels_last"):
        if data_format not in ("channels_last", "channels_first"):
            raise NotImplementedError
        self.c = int(normalized_shape)
        self.eps = float(eps)
        self.data_format = data_format
        # matches nn.Parameter(torch.ones/zeros(normalized_shape))
        self.weight = jnp.ones((self.c,), dtype=jnp.float32)
        self.bias = jnp.zeros((self.c,), dtype=jnp.float32)

    def __call__(self, x):
        if self.data_format == "channels_last":
            assert x.shape[-1] == self.c
            return _layernorm_channels_last(x, self.weight, self.bias, eps=self.eps)
        assert x.shape[1] == self.c
        return _layernorm_channels_first(x, self.weight, self.bias, eps=self.eps)


# ---------------------------------------------------------------------------
# References + smoke test
# ---------------------------------------------------------------------------

def _reference_channels_first(x, weight, bias, eps):
    u = jnp.mean(x, axis=1, keepdims=True)
    s = jnp.mean((x - u) ** 2, axis=1, keepdims=True)
    xn = (x - u) / jnp.sqrt(s + eps)
    return weight[None, :, None, None] * xn + bias[None, :, None, None]


def _reference_channels_last(x, weight, bias, eps):
    u = jnp.mean(x, axis=-1, keepdims=True)
    s = jnp.mean((x - u) ** 2, axis=-1, keepdims=True)
    return (x - u) / jnp.sqrt(s + eps) * weight + bias


if __name__ == "__main__":
    key = jax.random.PRNGKey(0)
    k1, k2, k3, k4 = jax.random.split(key, 4)

    # channels_first: NCHW input (like ConvNeXt downsample layers)
    N, C, H, W = 2, 4, 16, 16
    x_cf = jax.random.normal(k1, (N, C, H, W), dtype=jnp.float32)
    ln_cf = LayerNormPallas(C, eps=1e-6, data_format="channels_first")
    y_cf = jax.block_until_ready(ln_cf(x_cf))
    ref_cf = _reference_channels_first(x_cf, ln_cf.weight, ln_cf.bias, ln_cf.eps)
    assert y_cf.shape == x_cf.shape
    assert jnp.max(jnp.abs(y_cf - ref_cf)) < 1e-4

    # channels_last with tiny C=4 -> lane-packed path (rows divisible by k)
    x_cl = jax.random.normal(k2, (N, H, W, C), dtype=jnp.float32)
    ln_cl = LayerNormPallas(C, eps=1e-6, data_format="channels_last")
    y_cl = jax.block_until_ready(ln_cl(x_cl))
    ref_cl = _reference_channels_last(x_cl, ln_cl.weight, ln_cl.bias, ln_cl.eps)
    assert y_cl.shape == x_cl.shape
    assert jnp.max(jnp.abs(y_cl - ref_cl)) < 1e-4

    # channels_last with lane-aligned C=256 and a non-divisible row count
    C2 = 256
    x_big = jax.random.normal(k3, (3, 7, 5, C2), dtype=jnp.float32)
    ln_big = LayerNormPallas(C2, eps=1e-6, data_format="channels_last")
    y_big = jax.block_until_ready(ln_big(x_big))
    ref_big = _reference_channels_last(x_big, ln_big.weight, ln_big.bias, ln_big.eps)
    assert y_big.shape == x_big.shape
    assert jnp.max(jnp.abs(y_big - ref_big)) < 1e-4

    # channels_last with C=96 and rows not divisible by the pack factor
    # -> packed bulk + tiny remainder call
    C3 = 96
    x_rem = jax.random.normal(k4, (3, 7, 5, C3), dtype=jnp.float32)
    ln_rem = LayerNormPallas(C3, eps=1e-6, data_format="channels_last")
    y_rem = jax.block_until_ready(ln_rem(x_rem))
    ref_rem = _reference_channels_last(x_rem, ln_rem.weight, ln_rem.bias, ln_rem.eps)
    assert y_rem.shape == x_rem.shape
    assert jnp.max(jnp.abs(y_rem - ref_rem)) < 1e-4

    print("KERNEL_OK")
</pallas_src>

<mosaic_0001>
module attributes {stable_mosaic.version = 11 : i64} {
  func.func @_ln_cfirst_kernel(%arg0: i32, %arg1: i32, %arg2: memref<2x4x256xf32, #tpu.memory_space<vmem>>, %arg3: memref<1x4x1xf32, #tpu.memory_space<vmem>>, %arg4: memref<1x4x1xf32, #tpu.memory_space<vmem>>, %arg5: memref<2x4x256xf32, #tpu.memory_space<vmem>>) attributes {dimension_semantics = [#tpu.dimension_semantics<parallel>, #tpu.dimension_semantics<parallel>], iteration_bounds = array<i64: 1, 1>, scalar_prefetch = 0 : i64, scratch_operands = 0 : i64, tpu.core_type = #tpu.core_type<tc>, window_params = [{transform_indices = @transform_0, window_bounds = array<i64: 2, 4, 256>}, {pipeline_mode = #tpu.pipeline_mode<synchronous>, transform_indices = @transform_1, window_bounds = array<i64: 1, 4, 1>}, {pipeline_mode = #tpu.pipeline_mode<synchronous>, transform_indices = @transform_2, window_bounds = array<i64: 1, 4, 1>}, {transform_indices = @transform_3, window_bounds = array<i64: 2, 4, 256>}]} {
    %c0 = arith.constant 0 : index
    %c0_0 = arith.constant 0 : index
    %c0_1 = arith.constant 0 : index
    %0 = vector.load %arg2[%c0, %c0_0, %c0_1] : memref<2x4x256xf32, #tpu.memory_space<vmem>>, vector<2x4x256xf32>
    %cst = arith.constant dense<0.000000e+00> : vector<2x256xf32>
    %1 = vector.multi_reduction <add>, %0, %cst [1] : vector<2x4x256xf32> to vector<2x256xf32>
    %2 = vector.shape_cast %1 : vector<2x256xf32> to vector<2x1x256xf32>
    %cst_2 = arith.constant 2.500000e-01 : f32
    %3 = vector.broadcast %cst_2 : f32 to vector<2x1x256xf32>
    %4 = arith.mulf %2, %3 : vector<2x1x256xf32>
    %5 = vector.broadcast %4 : vector<2x1x256xf32> to vector<2x4x256xf32>
    %6 = arith.subf %0, %5 : vector<2x4x256xf32>
    %7 = arith.mulf %6, %6 : vector<2x4x256xf32>
    %cst_3 = arith.constant dense<0.000000e+00> : vector<2x256xf32>
    %8 = vector.multi_reduction <add>, %7, %cst_3 [1] : vector<2x4x256xf32> to vector<2x256xf32>
    %9 = vector.shape_cast %8 : vector<2x256xf32> to vector<2x1x256xf32>
    %cst_4 = arith.constant 2.500000e-01 : f32
    %10 = vector.broadcast %cst_4 : f32 to vector<2x1x256xf32>
    %11 = arith.mulf %9, %10 : vector<2x1x256xf32>
    %cst_5 = arith.constant 9.99999997E-7 : f32
    %12 = vector.broadcast %cst_5 : f32 to vector<2x1x256xf32>
    %13 = arith.addf %11, %12 : vector<2x1x256xf32>
    %14 = math.rsqrt %13 : vector<2x1x256xf32>
    %c0_6 = arith.constant 0 : index
    %c0_7 = arith.constant 0 : index
    %c0_8 = arith.constant 0 : index
    %15 = vector.load %arg3[%c0_6, %c0_7, %c0_8] : memref<1x4x1xf32, #tpu.memory_space<vmem>>, vector<1x4x1xf32>
    %c0_9 = arith.constant 0 : index
    %c0_10 = arith.constant 0 : index
    %c0_11 = arith.constant 0 : index
    %16 = vector.load %arg4[%c0_9, %c0_10, %c0_11] : memref<1x4x1xf32, #tpu.memory_space<vmem>>, vector<1x4x1xf32>
    %17 = vector.broadcast %14 : vector<2x1x256xf32> to vector<2x4x256xf32>
    %18 = arith.mulf %6, %17 : vector<2x4x256xf32>
    %19 = vector.broadcast %15 : vector<1x4x1xf32> to vector<2x4x256xf32>
    %20 = arith.mulf %18, %19 : vector<2x4x256xf32>
    %21 = vector.broadcast %16 : vector<1x4x1xf32> to vector<2x4x256xf32>
    %22 = arith.addf %20, %21 : vector<2x4x256xf32>
    %c0_12 = arith.constant 0 : index
    %c0_13 = arith.constant 0 : index
    %c0_14 = arith.constant 0 : index
    %23 = vector.load %arg5[%c0_12, %c0_13, %c0_14] : memref<2x4x256xf32, #tpu.memory_space<vmem>>, vector<2x4x256xf32>
    tpu.vector_store %arg5[%c0_12, %c0_13, %c0_14], %22 {strides = array<i32>} : memref<2x4x256xf32, #tpu.memory_space<vmem>>, vector<2x4x256xf32>,
    return
  }
  func.func @transform_0(%arg0: i32, %arg1: i32) -> (i32, i32, i32) {
    %c0_i32 = arith.constant 0 : i32
    %c0_i32_0 = arith.constant 0 : i32
    return %arg0, %c0_i32, %arg1 : i32, i32, i32
  }
  func.func @transform_1(%arg0: i32, %arg1: i32) -> (i32, i32, i32) {
    %c0_i32 = arith.constant 0 : i32
    %c0_i32_0 = arith.constant 0 : i32
    %c0_i32_1 = arith.constant 0 : i32
    %c0_i32_2 = arith.constant 0 : i32
    return %c0_i32, %c0_i32_0, %c0_i32_1 : i32, i32, i32
  }
  func.func @transform_2(%arg0: i32, %arg1: i32) -> (i32, i32, i32) {
    %c0_i32 = arith.constant 0 : i32
    %c0_i32_0 = arith.constant 0 : i32
    %c0_i32_1 = arith.constant 0 : i32
    %c0_i32_2 = arith.constant 0 : i32
    return %c0_i32, %c0_i32_0, %c0_i32_1 : i32, i32, i32
  }
  func.func @transform_3(%arg0: i32, %arg1: i32) -> (i32, i32, i32) {
    %c0_i32 = arith.constant 0 : i32
    %c0_i32_0 = arith.constant 0 : i32
    return %arg0, %c0_i32, %arg1 : i32, i32, i32
  }
}

</mosaic_0001>

<bundles_post_ra>
// kernel: _layernorm_channels_first.1
= control target key start
LH: loop header
LB: loop body
LE: loop exit
PB: predicated region body
PF: predicated region fallthrough
CT: control target
= control target key end

     0   :  { %v172_v0 = vmov 0   ;;  %vm22_vm0 = vcmask 1043456   ;;  %s220_s1 = inlined_call_operand.vmem [shape: f32[1,4,1], index: 1, kind: input, shape index: {}]   ;;  %s221_s2 = inlined_call_operand.vmem [shape: f32[1,4,1], index: 2, kind: input, shape index: {}]   ;;  %s222_s0 = inlined_call_operand.vmem [shape: f32[2,4,256], index: 0, kind: input, shape index: {}]   ;;  %s223_s3 = inlined_call_operand.vmem [shape: f32[2,4,256], index: 3, kind: output, shape index: {}]  }
   0x1   :  { %161 = vset.pattern.permute.xlu0 %v172_v0  ;;  %v113_v1 = vld [vmem:[%s220_s1] sm:$0xf]  ;;  %v15_v4 = vld [vmem:[%s222_s0 + $0x8] sm:$0xff] }
   0x2   :  { %127 = vperm.xlu0 %161, %v113_v1   ;;  %v114_v2 = vld [vmem:[%s221_s2] sm:$0xf]  ;;  %v19_v6 = vcombine.high %v15_v4, %v15_v4  ;;  %v37_v9 = vsel %vm22_vm0, %v15_v4, 0.0 }
   0x3   :  { %v14_v3 = vld [vmem:[%s222_s0] sm:$0xff]  ;;  %v38_v13 = vrot.slane %v37_v9, 4 }
   0x4   :  { %v18_v5 = vcombine.high %v14_v3, %v14_v3  ;;  %v23_v7 = vsel %vm22_vm0, %v14_v3, 0.0  ;;  %v44_v10 = vsel %vm22_vm0, %v19_v6, 0.0 }
   0x5   :  { %v24_v11 = vrot.slane %v23_v7, 4  ;;  %v45_v14 = vrot.slane %v44_v10, 4  ;;  %v39_v17 = vadd.f32 %v38_v13, %v37_v9 }
   0x6   :  { %141 = vperm.xlu0 %161, %v114_v2   ;;  %v30_v8 = vsel %vm22_vm0, %v18_v5, 0.0 }
   0x7   :  { %v31_v12 = vrot.slane %v30_v8, 4  ;;  %v25_v15 = vadd.f32 %v24_v11, %v23_v7  ;;  %v46_v18 = vadd.f32 %v45_v14, %v44_v10  ;;  %v40_v21 = vrot.slane %v39_v17, 2 }
   0x9   :  { %v32_v16 = vadd.f32 %v31_v12, %v30_v8  ;;  %v26_v19 = vrot.slane %v25_v15, 2  ;;  %v47_v22 = vrot.slane %v46_v18, 2  ;;  %v41_v25 = vadd.f32 %v40_v21, %v39_v17 }
   0xa   :  { %v132_v21 = vlaneseq }
   0xb   :  { %v33_v20 = vrot.slane %v32_v16, 2  ;;  %v27_v23 = vadd.f32 %v26_v19, %v25_v15  ;;  %v48_v26 = vadd.f32 %v47_v22, %v46_v18  ;;  %v42_v29 = vrot.slane %v41_v25, 1 }
   0xc   :  { %v173_v19 = vmov 839922192  }
   0xd   :  { %v34_v24 = vadd.f32 %v33_v20, %v32_v16  ;;  %v28_v27 = vrot.slane %v27_v23, 1  ;;  %v49_v30 = vrot.slane %v48_v26, 1  ;;  %v43_v33 = vadd.f32 %v42_v29, %v41_v25 }
   0xe   :  { %v130_v20 = vunpack.c.l.s4 %v173_v19 }
   0xf   :  { %v35_v28 = vrot.slane %v34_v24, 1  ;;  %v29_v31 = vadd.f32 %v28_v27, %v27_v23  ;;  %v50_v34 = vadd.f32 %v49_v30, %v48_v26  ;;  %v53_v37 = vmul.f32 0.25, %v43_v33 }
  0x10   :  { %v131_v25 = vunpack.c.0.s8 %v130_v20  ;;  %v133_v26 = vshrl.u32 %v132_v21, 7 }
  0x11   :  { %v36_v32 = vadd.f32 %v35_v28, %v34_v24  ;;  %v51_v35 = vmul.f32 0.25, %v29_v31  ;;  %v54_v38 = vmul.f32 0.25, %v50_v34 }
  0x12   :  { %v134_v28 = vsub.s32 %v131_v25, %v133_v26 }
  0x13   :  { %v52_v36 = vmul.f32 0.25, %v36_v32  ;;  %v60_v40 = vcombine.low %v53_v37, %v54_v38 }
  0x15   :  { %v59_v39 = vcombine.low %v51_v35, %v52_v36  ;;  %v64_v42 = vsub.f32 %v15_v4, %v60_v40 }
  0x17   :  { %v63_v41 = vsub.f32 %v14_v3, %v59_v39  ;;  %v66_v44 = vmul.f32 %v64_v42, %v64_v42 }
  0x19   :  { %v65_v43 = vmul.f32 %v63_v41, %v63_v41  ;;  %v70_v46 = vcombine.high %v66_v44, %v66_v44  ;;  %v87_v48 = vsel %vm22_vm0, %v66_v44, 0.0 }
  0x1a   :  { %v88_v52 = vrot.slane %v87_v48, 4 }
  0x1b   :  { %v69_v45 = vcombine.high %v65_v43, %v65_v43  ;;  %v73_v47 = vsel %vm22_vm0, %v65_v43, 0.0  ;;  %v94_v51 = vsel %vm22_vm0, %v70_v46, 0.0 }
  0x1c   :  { %v74_v50 = vrot.slane %v73_v47, 4  ;;  %v95_v54 = vrot.slane %v94_v51, 4  ;;  %v89_v56 = vadd.f32 %v88_v52, %v87_v48 }
  0x1d   :  { %v80_v49 = vsel %vm22_vm0, %v69_v45, 0.0 }
  0x1e   :  { %v81_v53 = vrot.slane %v80_v49, 4  ;;  %v75_v55 = vadd.f32 %v74_v50, %v73_v47  ;;  %v96_v58 = vadd.f32 %v95_v54, %v94_v51  ;;  %v90_v60 = vrot.slane %v89_v56, 2 }
  0x20   :  { %v82_v57 = vadd.f32 %v81_v53, %v80_v49  ;;  %v76_v59 = vrot.slane %v75_v55, 2  ;;  %v97_v62 = vrot.slane %v96_v58, 2  ;;  %v91_v0 = vadd.f32 %v90_v60, %v89_v56 }
  0x22   :  { %v83_v61 = vrot.slane %v82_v57, 2  ;;  %v77_v63 = vadd.f32 %v76_v59, %v75_v55  ;;  %v98_v2 = vadd.f32 %v97_v62, %v96_v58  ;;  %v92_v4 = vrot.slane %v91_v0, 1 }
  0x24   :  { %v84_v1 = vadd.f32 %v83_v61, %v82_v57  ;;  %v78_v3 = vrot.slane %v77_v63, 1  ;;  %v99_v6 = vrot.slane %v98_v2, 1  ;;  %v93_v8 = vadd.f32 %v92_v4, %v91_v0 }
  0x26   :  { %v85_v5 = vrot.slane %v84_v1, 1  ;;  %v79_v7 = vadd.f32 %v78_v3, %v77_v63  ;;  %v100_v10 = vadd.f32 %v99_v6, %v98_v2  ;;  %v103_v12 = vmul.f32 0.25, %v93_v8 }
  0x28   :  { %v86_v9 = vadd.f32 %v85_v5, %v84_v1  ;;  %v101_v11 = vmul.f32 0.25, %v79_v7  ;;  %v104_v14 = vmul.f32 0.25, %v100_v10  ;;  %v107_v16 = vadd.f32 1e-06, %v103_v12 }
  0x2a   :  { %v102_v13 = vmul.f32 0.25, %v86_v9  ;;  %v105_v15 = vadd.f32 1e-06, %v101_v11  ;;  %v108_v18 = vadd.f32 1e-06, %v104_v14 }
  0x2c   :  { %v106_v17 = vadd.f32 1e-06, %v102_v13  ;;  %164 = vrsqrt.f32 %v105_v15 }
  0x2d   :  { %166 = vrsqrt.f32 %v107_v16 }
  0x2e   :  { %168 = vrsqrt.f32 %v106_v17 }
  0x2f   :  { %170 = vrsqrt.f32 %v108_v18 }
  0x36   :  { %v165_v22 = vpop.eup %164 }
  0x37   :  { %v167_v23 = vpop.eup %166 }
  0x38   :  { %v169_v24 = vpop.eup %168 }
  0x39   :  { %v171_v27 = vpop.eup %170  ;;  %v119_v29 = vcombine.low %v165_v22, %v169_v24 }
  0x3a   :  { %v120_v30 = vcombine.low %v167_v23, %v171_v27 }
  0x3b   :  { %v123_v32 = vmul.f32 %v119_v29, %v63_v41 }
  0x3c   :  { %v124_v33 = vmul.f32 %v120_v30, %v64_v42 }
  0x81   :  { %v128_v31 = vpop.permute.xlu0 %127 }
  0x82   :  { %v135_v34 = vrot.slane %v128_v31, %v134_v28 }
  0x84   :  { %v137_v36 = vmul.f32 %v135_v34, %v123_v32  ;;  %v138_v37 = vmul.f32 %v135_v34, %v124_v33 }
  0x85   :  { %v142_v35 = vpop.permute.xlu0 %141 }
  0x86   :  { %v149_v38 = vrot.slane %v142_v35, %v134_v28 }
  0x88   :  { %v151_v39 = vadd.f32 %v149_v38, %v137_v36  ;;  %v152_v40 = vadd.f32 %v149_v38, %v138_v37 }
  0x8a   :  { %153 = vst [vmem:[%s223_s3] sm:$0xff] %v151_v39  ;;  %154 = vst [vmem:[%s223_s3 + $0x8] sm:$0xff] %v152_v40 }

</bundles_post_ra>
